<compile_context>
chip_gen: v7x
topology: tpu7x:2x2x1
jax: 0.10.0
libtpu: 0.0.40
codegen_flags: <defaults>
</compile_context>

<pallas_src>
import functools

import jax
import jax.numpy as jnp
from jax.experimental import pallas as pl
from jax.experimental.pallas import tpu as pltpu

_MIB = 1024 * 1024


# --------------------------------------------------------------------------- #
# Kernel
# --------------------------------------------------------------------------- #
def node_df_kernel(g_ref, sp_ref, x_ref, w_ref, b_ref, *rest,
                   tb, has_elem_t, elem_is_full):
    """One batch tile of the NODE right-hand side.

    x_ref    : (2, tb, D)    f32        [h; m] tile (streamed, double-buffered)
    w_ref    : (D, D)        bf16/f32   sign-folded weight, resident in VMEM
    b_ref    : (1, D)        f32        sign-folded bias,   resident in VMEM
    elem_ref : (2, B_pad, 1) f32        resident elem_t (optional)
    out_ref  : (2, tb, D)    f32
    """
    if has_elem_t:
        elem_ref, out_ref = rest
    else:
        (out_ref,) = rest

    g = g_ref[0, 0]      # sigmoid(gamma), precomputed in the wrapper
    sp = sp_ref[0, 0]    # softplus(corr), precomputed in the wrapper

    h = x_ref[0]         # [tb, D] f32
    m = x_ref[1]         # [tb, D] f32

    # inner df(t, h) = h @ (W*sign) + b*sign  (MXU, f32 accumulation)
    df = jnp.dot(h.astype(w_ref.dtype), w_ref[...],
                 preferred_element_type=jnp.float32) + b_ref[...]

    dh = -m                          # actv_h = Identity
    dm = df - g * m + sp * h         # sign already folded into W and b

    if has_elem_t:
        if elem_is_full:             # single batch tile: read the whole thing
            e = elem_ref[...]
        else:                        # resident elem_t: slice this tile's rows
            start = pl.multiple_of(pl.program_id(0) * tb, 8)
            e = elem_ref[:, pl.ds(start, tb), :]
        dh = dh * e[0]               # [tb,1] broadcast over D
        dm = dm * e[1]

    out_ref[0] = dh
    out_ref[1] = dm


# --------------------------------------------------------------------------- #
# Parameter preparation (done once, not per RHS eval)
# --------------------------------------------------------------------------- #
def prepare_node_params(W, b, gamma, corr, *, sign=1.0, weight_dtype=jnp.bfloat16):
    """Fold `sign` into W/b, precompute sigmoid/softplus, cast W to MXU dtype."""
    W = jnp.asarray(W, jnp.float32)
    b = jnp.asarray(b, jnp.float32)
    D, N = W.shape
    assert D == N, "df weight must be square (state dim -> state dim)"
    w_s = (W * sign).astype(weight_dtype)                 # sign folded, MXU dtype
    b_s = (b * sign).reshape(1, N).astype(jnp.float32)    # sign folded
    g = jnp.reshape(jax.nn.sigmoid(jnp.asarray(gamma, jnp.float32)), (1, 1))
    sp = jnp.reshape(jax.nn.softplus(jnp.asarray(corr, jnp.float32)), (1, 1))
    return {"W": w_s, "b": b_s, "g": g, "sp": sp}


# --------------------------------------------------------------------------- #
# Tiling / hardware helpers
# --------------------------------------------------------------------------- #
def _round_up(v, m):
    return ((v + m - 1) // m) * m


def _round_down(v, m):
    return (v // m) * m


def _tpu_vmem_capacity_bytes():
    try:
        return int(pltpu.get_tpu_info().vmem_capacity_bytes)
    except Exception:
        return 64 * _MIB   # conservative default (v7x per-TensorCore VMEM)


def _select_batch_tile(B, D, *, requested, small_vmem, vmem_limit, w_itemsize,
                       has_elem_t):
    """Pick a batch tile: big enough to beat per-step overhead, fits VMEM."""
    # Each batch row moves 16*D bytes per step (f32 in + f32 out, 2 channels);
    # aim for >= ~2 MiB per grid step, clamped to [256, 1024] rows.
    cap = (2 * _MIB) // (16 * max(D, 1))
    cap = _round_down(max(256, min(1024, cap)), 8)

    if requested is not None:
        tb = int(requested)
        tb = B if tb >= B else max(8, _round_down(tb, 8))
    elif B <= cap:
        tb = B
    else:
        tb = 0
        for cand in range(cap, 7, -8):       # largest multiple-of-8 divisor <= cap
            if B % cand == 0:
                tb = cand
                break
        if tb < max(8, cap // 2):
            tb = cap                          # no good divisor -> pad the last tile

    # v7x-like chips have 2 TensorCores: make sure the 'parallel' batch-tile
    # axis has at least 2 steps so both cores get work.
    if requested is None and small_vmem and tb >= B and B >= 16:
        tb = _round_up((B + 1) // 2, 8)

    # VMEM-fit check: resident W/b (+ elem_t) single-buffered, x/out tiles
    # double-buffered.  Shrink tb until it fits instead of blowing the limit.
    budget = int(0.85 * vmem_limit)
    resident = D * D * w_itemsize + 8 * D * 4
    if has_elem_t:
        resident += 2 * _round_up(max(B, tb), 8) * 128 * 4   # lane-padded elem_t

    def act_bytes(t):
        return 2 * (2 * t * D * 4) * 2        # x tile + out tile, double-buffered

    while tb > 8 and resident + act_bytes(tb) > budget:
        tb = max(8, _round_down(max(tb // 2, 8), 8))
    if resident + act_bytes(tb) > budget:
        # TODO(synk): tile W along its N dim (block (D, tn)) once D*D*itemsize
        # alone no longer fits VMEM (roughly D >~ 4K on v7x, 6-7K on v5e/v6e).
        raise NotImplementedError(
            f"df weight ({D}x{D}) does not fit the VMEM budget; "
            "N-tiling of W is not implemented yet")
    return tb


def _normalize_elem_t(elem_t, B):
    """Accept scalar, [B], [2,B] or [B,2] elem_t; return [2, B, 1] f32."""
    e = jnp.asarray(elem_t, jnp.float32)
    if e.ndim == 0:
        e = jnp.broadcast_to(e, (2, B))
    elif e.ndim == 1:
        e = jnp.broadcast_to(e[None, :], (2, B))    # per-sample scale
    elif e.shape == (2, B):
        pass
    elif e.shape == (B, 2):
        e = e.T
    else:
        raise ValueError(f"elem_t shape {e.shape} incompatible with batch {B}")
    return e.reshape(2, B, 1)


# --------------------------------------------------------------------------- #
# pallas_call construction
# --------------------------------------------------------------------------- #
def _build_node_call(*, B_pad, D, tb, nb, has_elem_t, w_dtype, vmem_limit,
                     single_buffer_resident):
    resident_kw = ({"pipeline_mode": pl.Buffered(1)}
                   if single_buffer_resident else {})
    smem = pl.BlockSpec(memory_space=pltpu.MemorySpace.SMEM)

    in_specs = [
        smem,                                                      # sigmoid(gamma)
        smem,                                                      # softplus(corr)
        pl.BlockSpec((2, tb, D), lambda i: (0, i, 0)),             # x tile (streamed)
        pl.BlockSpec((D, D), lambda i: (0, 0), **resident_kw),     # W: resident
        pl.BlockSpec((1, D), lambda i: (0, 0), **resident_kw),     # b: resident
    ]
    if has_elem_t:
        # elem_t is tiny (8*B bytes): keep the whole array resident and slice
        # per tile inside the kernel (no lane-width-1 DMA per grid step).
        in_specs.append(
            pl.BlockSpec((2, B_pad, 1), lambda i: (0, 0, 0), **resident_kw))

    kernel = functools.partial(node_df_kernel, tb=tb, has_elem_t=has_elem_t,
                               elem_is_full=(nb == 1))

    w_itemsize = jnp.dtype(w_dtype).itemsize
    flops = 2 * B_pad * D * D + 6 * B_pad * D
    bytes_accessed = ((2 * B_pad * D * 4) * 2 + D * D * w_itemsize + D * 4 + 8
                      + (2 * B_pad * 4 if has_elem_t else 0))

    return pl.pallas_call(
        kernel,
        grid=(nb,),
        in_specs=in_specs,
        out_specs=pl.BlockSpec((2, tb, D), lambda i: (0, i, 0)),
        out_shape=jax.ShapeDtypeStruct((2, B_pad, D), jnp.float32),
        compiler_params=pltpu.CompilerParams(
            dimension_semantics=("parallel",),   # batch tiles shard across TCs
            vmem_limit_bytes=vmem_limit),
        cost_estimate=pl.CostEstimate(flops=flops, transcendentals=0,
                                      bytes_accessed=bytes_accessed),
    )


def node_forward(x, params, *, elem_t=None, batch_tile=None):
    """NODE forward.  x: [2, B, D] f32 (h = x[0], m = x[1]).  Returns [2, B, D]."""
    x = jnp.asarray(x, jnp.float32)
    two, B, D = x.shape
    assert two == 2
    W, b2, g, sp = params["W"], params["b"], params["g"], params["sp"]
    assert W.shape == (D, D) and b2.shape == (1, D)

    vmem_cap = _tpu_vmem_capacity_bytes()
    small_vmem = vmem_cap <= 64 * _MIB                      # v7x-like
    vmem_limit = 48 * _MIB if small_vmem else 100 * _MIB    # v5e/v6e: 128 MiB phys

    has_elem_t = elem_t is not None
    tb = _select_batch_tile(B, D, requested=batch_tile, small_vmem=small_vmem,
                            vmem_limit=vmem_limit, w_itemsize=W.dtype.itemsize,
                            has_elem_t=has_elem_t)
    B_pad = _round_up(B, tb)
    nb = B_pad // tb

    x_pad = x if B_pad == B else jnp.pad(x, ((0, 0), (0, B_pad - B), (0, 0)))
    args = [g, sp, x_pad, W, b2]
    if has_elem_t:
        e = _normalize_elem_t(elem_t, B)
        if B_pad != B:
            e = jnp.pad(e, ((0, 0), (0, B_pad - B), (0, 0)))
        args.append(e)

    build = functools.partial(_build_node_call, B_pad=B_pad, D=D, tb=tb, nb=nb,
                              has_elem_t=has_elem_t, w_dtype=W.dtype,
                              vmem_limit=vmem_limit)
    try:
        out = build(single_buffer_resident=True)(*args)
    except Exception:
        # Fallback if pl.Buffered(1) is rejected: default (double-buffered)
        # pipelining of the resident operands.
        out = build(single_buffer_resident=False)(*args)

    return out if B_pad == B else out[:, :B, :]


# --------------------------------------------------------------------------- #
# Module wrapper + pure-JAX reference
# --------------------------------------------------------------------------- #
class NODE:
    """Thin port of the PyTorch NODE module (forward pass only)."""

    def __init__(self, df_params, sign=1.0, weight_dtype=jnp.bfloat16):
        W, b, gamma, corr = df_params
        # Cast/fold once (not per RHS eval): sign folded into W and b,
        # sigmoid/softplus precomputed, W cast to the MXU dtype.
        # Use weight_dtype=jnp.float32 for a full-precision fallback path.
        self.params = prepare_node_params(W, b, gamma, corr, sign=sign,
                                          weight_dtype=weight_dtype)
        self.nfe = 0          # host-side bookkeeping (trace-time only if jitted)
        self.elem_t = None

    def update(self, elem_t):
        # PyTorch: elem_t.view(*elem_t.shape, 1); the trailing singleton
        # broadcast is applied inside node_forward.
        self.elem_t = elem_t

    def __call__(self, t, x, *, batch_tile=None):
        self.nfe += 1
        return node_forward(x, self.params, elem_t=self.elem_t,
                            batch_tile=batch_tile)


def node_reference(x, gamma, corr, W, b, *, sign=1.0, elem_t=None):
    h, m = x[0], x[1]
    dh = -m
    df = h @ W + b[None, :]
    dm = df * sign - jax.nn.sigmoid(gamma) * m + jax.nn.softplus(corr) * h
    out = jnp.stack([dh, dm], axis=0)
    if elem_t is not None:
        out = elem_t[..., None] * out
    return out


# --------------------------------------------------------------------------- #
# Demo / self-test
# --------------------------------------------------------------------------- #
if __name__ == "__main__":
    key = jax.random.PRNGKey(0)
    k_x, k_w, k_b, k_e, k_x2, k_e2 = jax.random.split(key, 6)

    B, D = 64, 128                      # small, lane-aligned (D multiple of 128)
    x = jax.random.normal(k_x, (2, B, D), dtype=jnp.float32)   # state [h; m]

    gamma = jnp.array(-3.0, dtype=jnp.float32)
    corr = jnp.array(-100.0, dtype=jnp.float32)
    W = jax.random.normal(k_w, (D, D), dtype=jnp.float32) * (1.0 / jnp.sqrt(D))
    b = jax.random.normal(k_b, (D,), dtype=jnp.float32) * 0.01

    node = NODE((W, b, gamma, corr), sign=1.0)

    # Default NODE path: elem_t is None -> out = df(t, x); auto tile selection.
    out = jax.block_until_ready(node(0.0, x))
    ref = node_reference(x, gamma, corr, W, b, sign=1.0)
    assert out.shape == (2, B, D)
    # bf16 weights on the MXU (f32 accumulation) -> slightly looser tolerance
    assert jnp.allclose(out, ref, rtol=2e-2, atol=2e-2), "mismatch (default path)"

    # elem_t path: out = elem_t * df(elem_t, x); forced multi-tile grid so the
    # resident elem_t dynamic-slice path (and the 2-TC split) is exercised.
    elem_t = jax.random.uniform(k_e, (2, B), dtype=jnp.float32, minval=0.5, maxval=1.5)
    node.update(elem_t)
    out_e = jax.block_until_ready(node(0.0, x, batch_tile=32))
    ref_e = node_reference(x, gamma, corr, W, b, sign=1.0, elem_t=elem_t)
    assert jnp.allclose(out_e, ref_e, rtol=2e-2, atol=2e-2), "mismatch (elem_t path)"

    # Ragged batch (padding path) + per-sample elem_t + non-unit sign folding.
    B2 = 30
    x2 = jax.random.normal(k_x2, (2, B2, D), dtype=jnp.float32)
    e2 = jax.random.uniform(k_e2, (B2,), dtype=jnp.float32, minval=0.5, maxval=1.5)
    node2 = NODE((W, b, gamma, corr), sign=-0.5)
    node2.update(e2)
    out2 = jax.block_until_ready(node2(0.0, x2, batch_tile=16))
    ref2 = node_reference(x2, gamma, corr, W, b, sign=-0.5,
                          elem_t=jnp.broadcast_to(e2[None, :], (2, B2)))
    assert out2.shape == (2, B2, D)
    assert jnp.allclose(out2, ref2, rtol=2e-2, atol=2e-2), "mismatch (padded path)"

    print("KERNEL_OK")
</pallas_src>

<mosaic_0001>
module attributes {stable_mosaic.version = 11 : i64} {
  func.func @node_df_kernel(%arg0: i32, %arg1: memref<1x1xf32, #tpu.memory_space<smem>>, %arg2: memref<1x1xf32, #tpu.memory_space<smem>>, %arg3: memref<2x32x128xf32, #tpu.memory_space<vmem>>, %arg4: memref<128x128xbf16, #tpu.memory_space<vmem>>, %arg5: memref<1x128xf32, #tpu.memory_space<vmem>>, %arg6: memref<2x32x128xf32, #tpu.memory_space<vmem>>) attributes {dimension_semantics = [#tpu.dimension_semantics<parallel>], iteration_bounds = array<i64: 2>, scalar_prefetch = 0 : i64, scratch_operands = 0 : i64, tpu.core_type = #tpu.core_type<tc>, window_params = [{transform_indices = @transform_0, window_bounds = array<i64: 1, 1>}, {transform_indices = @transform_1, window_bounds = array<i64: 1, 1>}, {transform_indices = @transform_2, window_bounds = array<i64: 2, 32, 128>}, {pipeline_mode = #tpu.pipeline_mode<synchronous>, transform_indices = @transform_3, window_bounds = array<i64: 128, 128>}, {pipeline_mode = #tpu.pipeline_mode<synchronous>, transform_indices = @transform_4, window_bounds = array<i64: 1, 128>}, {transform_indices = @transform_5, window_bounds = array<i64: 2, 32, 128>}]} {
    %c0 = arith.constant 0 : index
    %c0_0 = arith.constant 0 : index
    %0 = memref.load %arg1[%c0, %c0_0] : memref<1x1xf32, #tpu.memory_space<smem>>
    %c0_1 = arith.constant 0 : index
    %c0_2 = arith.constant 0 : index
    %1 = memref.load %arg2[%c0_1, %c0_2] : memref<1x1xf32, #tpu.memory_space<smem>>
    %c0_3 = arith.constant 0 : index
    %c0_4 = arith.constant 0 : index
    %c0_5 = arith.constant 0 : index
    %2 = vector.load %arg3[%c0_3, %c0_4, %c0_5] : memref<2x32x128xf32, #tpu.memory_space<vmem>>, vector<1x32x128xf32>
    %3 = vector.shape_cast %2 : vector<1x32x128xf32> to vector<32x128xf32>
    %c1 = arith.constant 1 : index
    %c0_6 = arith.constant 0 : index
    %c0_7 = arith.constant 0 : index
    %4 = vector.load %arg3[%c1, %c0_6, %c0_7] : memref<2x32x128xf32, #tpu.memory_space<vmem>>, vector<1x32x128xf32>
    %5 = vector.shape_cast %4 : vector<1x32x128xf32> to vector<32x128xf32>
    %6 = arith.truncf %3 : vector<32x128xf32> to vector<32x128xbf16>
    %c0_8 = arith.constant 0 : index
    %c0_9 = arith.constant 0 : index
    %7 = vector.load %arg4[%c0_8, %c0_9] : memref<128x128xbf16, #tpu.memory_space<vmem>>, vector<128x128xbf16>
    %cst = arith.constant dense<0.000000e+00> : vector<32x128xf32>
    %8 = tpu.matmul %6, %7, %cst {dimension_numbers = #tpu.dot_dimension_numbers<[1], [0], [0], [1], [0, 0, 1, 1], [], []>} : vector<32x128xbf16>, vector<128x128xbf16>, vector<32x128xf32> -> vector<32x128xf32>
    %c0_10 = arith.constant 0 : index
    %c0_11 = arith.constant 0 : index
    %9 = vector.load %arg5[%c0_10, %c0_11] : memref<1x128xf32, #tpu.memory_space<vmem>>, vector<1x128xf32>
    %10 = vector.broadcast %9 : vector<1x128xf32> to vector<32x128xf32>
    %11 = arith.addf %8, %10 : vector<32x128xf32>
    %cst_12 = arith.constant 0.000000e+00 : f32
    %12 = vector.broadcast %cst_12 : f32 to vector<32x128xf32>
    %13 = arith.subf %12, %5 : vector<32x128xf32>
    %14 = vector.broadcast %0 : f32 to vector<32x128xf32>
    %15 = arith.mulf %14, %5 : vector<32x128xf32>
    %16 = arith.subf %11, %15 : vector<32x128xf32>
    %17 = vector.broadcast %1 : f32 to vector<32x128xf32>
    %18 = arith.mulf %17, %3 : vector<32x128xf32>
    %19 = arith.addf %16, %18 : vector<32x128xf32>
    %c0_13 = arith.constant 0 : index
    %c0_14 = arith.constant 0 : index
    %c0_15 = arith.constant 0 : index
    %20 = vector.load %arg6[%c0_13, %c0_14, %c0_15] : memref<2x32x128xf32, #tpu.memory_space<vmem>>, vector<1x32x128xf32>
    %21 = vector.shape_cast %20 : vector<1x32x128xf32> to vector<32x128xf32>
    %22 = vector.shape_cast %13 : vector<32x128xf32> to vector<1x32x128xf32>
    tpu.vector_store %arg6[%c0_13, %c0_14, %c0_15], %22 {strides = array<i32>} : memref<2x32x128xf32, #tpu.memory_space<vmem>>, vector<1x32x128xf32>,
    %c1_16 = arith.constant 1 : index
    %c0_17 = arith.constant 0 : index
    %c0_18 = arith.constant 0 : index
    %23 = vector.load %arg6[%c1_16, %c0_17, %c0_18] : memref<2x32x128xf32, #tpu.memory_space<vmem>>, vector<1x32x128xf32>
    %24 = vector.shape_cast %23 : vector<1x32x128xf32> to vector<32x128xf32>
    %25 = vector.shape_cast %19 : vector<32x128xf32> to vector<1x32x128xf32>
    tpu.vector_store %arg6[%c1_16, %c0_17, %c0_18], %25 {strides = array<i32>} : memref<2x32x128xf32, #tpu.memory_space<vmem>>, vector<1x32x128xf32>,
    return
  }
  func.func @transform_0(%arg0: i32) -> (i32, i32) {
    %c0_i32 = arith.constant 0 : i32
    %c0_i32_0 = arith.constant 0 : i32
    %c0_i32_1 = arith.constant 0 : i32
    return %c0_i32, %c0_i32_0 : i32, i32
  }
  func.func @transform_1(%arg0: i32) -> (i32, i32) {
    %c0_i32 = arith.constant 0 : i32
    %c0_i32_0 = arith.constant 0 : i32
    %c0_i32_1 = arith.constant 0 : i32
    return %c0_i32, %c0_i32_0 : i32, i32
  }
  func.func @transform_2(%arg0: i32) -> (i32, i32, i32) {
    %c0_i32 = arith.constant 0 : i32
    %c0_i32_0 = arith.constant 0 : i32
    %c0_i32_1 = arith.constant 0 : i32
    return %c0_i32, %arg0, %c0_i32_0 : i32, i32, i32
  }
  func.func @transform_3(%arg0: i32) -> (i32, i32) {
    %c0_i32 = arith.constant 0 : i32
    %c0_i32_0 = arith.constant 0 : i32
    %c0_i32_1 = arith.constant 0 : i32
    return %c0_i32, %c0_i32_0 : i32, i32
  }
  func.func @transform_4(%arg0: i32) -> (i32, i32) {
    %c0_i32 = arith.constant 0 : i32
    %c0_i32_0 = arith.constant 0 : i32
    %c0_i32_1 = arith.constant 0 : i32
    return %c0_i32, %c0_i32_0 : i32, i32
  }
  func.func @transform_5(%arg0: i32) -> (i32, i32, i32) {
    %c0_i32 = arith.constant 0 : i32
    %c0_i32_0 = arith.constant 0 : i32
    %c0_i32_1 = arith.constant 0 : i32
    return %c0_i32, %arg0, %c0_i32_0 : i32, i32, i32
  }
}

module attributes {stable_mosaic.version = 11 : i64} {
  func.func @node_df_kernel(%arg0: i32, %arg1: memref<1x1xf32, #tpu.memory_space<smem>>, %arg2: memref<1x1xf32, #tpu.memory_space<smem>>, %arg3: memref<2x32x128xf32, #tpu.memory_space<vmem>>, %arg4: memref<128x128xbf16, #tpu.memory_space<vmem>>, %arg5: memref<1x128xf32, #tpu.memory_space<vmem>>, %arg6: memref<2x32x128xf32, #tpu.memory_space<vmem>>) attributes {dimension_semantics = [#tpu.dimension_semantics<parallel>], iteration_bounds = array<i64: 2>, scalar_prefetch = 0 : i64, scratch_operands = 0 : i64, tpu.core_type = #tpu.core_type<tc>, window_params = [{transform_indices = @transform_0, window_bounds = array<i64: 1, 1>}, {transform_indices = @transform_1, window_bounds = array<i64: 1, 1>}, {transform_indices = @transform_2, window_bounds = array<i64: 2, 32, 128>}, {pipeline_mode = #tpu.pipeline_mode<synchronous>, transform_indices = @transform_3, window_bounds = array<i64: 128, 128>}, {pipeline_mode = #tpu.pipeline_mode<synchronous>, transform_indices = @transform_4, window_bounds = array<i64: 1, 128>}, {transform_indices = @transform_5, window_bounds = array<i64: 2, 32, 128>}]} {
    %c0 = arith.constant 0 : index
    %c0_0 = arith.constant 0 : index
    %0 = memref.load %arg1[%c0, %c0_0] : memref<1x1xf32, #tpu.memory_space<smem>>
    %c0_1 = arith.constant 0 : index
    %c0_2 = arith.constant 0 : index
    %1 = memref.load %arg2[%c0_1, %c0_2] : memref<1x1xf32, #tpu.memory_space<smem>>
    %c0_3 = arith.constant 0 : index
    %c0_4 = arith.constant 0 : index
    %c0_5 = arith.constant 0 : index
    %2 = vector.load %arg3[%c0_3, %c0_4, %c0_5] : memref<2x32x128xf32, #tpu.memory_space<vmem>>, vector<1x32x128xf32>
    %3 = vector.shape_cast %2 : vector<1x32x128xf32> to vector<32x128xf32>
    %c1 = arith.constant 1 : index
    %c0_6 = arith.constant 0 : index
    %c0_7 = arith.constant 0 : index
    %4 = vector.load %arg3[%c1, %c0_6, %c0_7] : memref<2x32x128xf32, #tpu.memory_space<vmem>>, vector<1x32x128xf32>
    %5 = vector.shape_cast %4 : vector<1x32x128xf32> to vector<32x128xf32>
    %6 = arith.truncf %3 : vector<32x128xf32> to vector<32x128xbf16>
    %c0_8 = arith.constant 0 : index
    %c0_9 = arith.constant 0 : index
    %7 = vector.load %arg4[%c0_8, %c0_9] : memref<128x128xbf16, #tpu.memory_space<vmem>>, vector<128x128xbf16>
    %cst = arith.constant dense<0.000000e+00> : vector<32x128xf32>
    %8 = tpu.matmul %6, %7, %cst {dimension_numbers = #tpu.dot_dimension_numbers<[1], [0], [0], [1], [0, 0, 1, 1], [], []>} : vector<32x128xbf16>, vector<128x128xbf16>, vector<32x128xf32> -> vector<32x128xf32>
    %c0_10 = arith.constant 0 : index
    %c0_11 = arith.constant 0 : index
    %9 = vector.load %arg5[%c0_10, %c0_11] : memref<1x128xf32, #tpu.memory_space<vmem>>, vector<1x128xf32>
    %10 = vector.broadcast %9 : vector<1x128xf32> to vector<32x128xf32>
    %11 = arith.addf %8, %10 : vector<32x128xf32>
    %cst_12 = arith.constant 0.000000e+00 : f32
    %12 = vector.broadcast %cst_12 : f32 to vector<32x128xf32>
    %13 = arith.subf %12, %5 : vector<32x128xf32>
    %14 = vector.broadcast %0 : f32 to vector<32x128xf32>
    %15 = arith.mulf %14, %5 : vector<32x128xf32>
    %16 = arith.subf %11, %15 : vector<32x128xf32>
    %17 = vector.broadcast %1 : f32 to vector<32x128xf32>
    %18 = arith.mulf %17, %3 : vector<32x128xf32>
    %19 = arith.addf %16, %18 : vector<32x128xf32>
    %c0_13 = arith.constant 0 : index
    %c0_14 = arith.constant 0 : index
    %c0_15 = arith.constant 0 : index
    %20 = vector.load %arg6[%c0_13, %c0_14, %c0_15] : memref<2x32x128xf32, #tpu.memory_space<vmem>>, vector<1x32x128xf32>
    %21 = vector.shape_cast %20 : vector<1x32x128xf32> to vector<32x128xf32>
    %22 = vector.shape_cast %13 : vector<32x128xf32> to vector<1x32x128xf32>
    tpu.vector_store %arg6[%c0_13, %c0_14, %c0_15], %22 {strides = array<i32>} : memref<2x32x128xf32, #tpu.memory_space<vmem>>, vector<1x32x128xf32>,
    %c1_16 = arith.constant 1 : index
    %c0_17 = arith.constant 0 : index
    %c0_18 = arith.constant 0 : index
    %23 = vector.load %arg6[%c1_16, %c0_17, %c0_18] : memref<2x32x128xf32, #tpu.memory_space<vmem>>, vector<1x32x128xf32>
    %24 = vector.shape_cast %23 : vector<1x32x128xf32> to vector<32x128xf32>
    %25 = vector.shape_cast %19 : vector<32x128xf32> to vector<1x32x128xf32>
    tpu.vector_store %arg6[%c1_16, %c0_17, %c0_18], %25 {strides = array<i32>} : memref<2x32x128xf32, #tpu.memory_space<vmem>>, vector<1x32x128xf32>,
    return
  }
  func.func @transform_0(%arg0: i32) -> (i32, i32) {
    %c0_i32 = arith.constant 0 : i32
    %c0_i32_0 = arith.constant 0 : i32
    %c0_i32_1 = arith.constant 0 : i32
    return %c0_i32, %c0_i32_0 : i32, i32
  }
  func.func @transform_1(%arg0: i32) -> (i32, i32) {
    %c0_i32 = arith.constant 0 : i32
    %c0_i32_0 = arith.constant 0 : i32
    %c0_i32_1 = arith.constant 0 : i32
    return %c0_i32, %c0_i32_0 : i32, i32
  }
  func.func @transform_2(%arg0: i32) -> (i32, i32, i32) {
    %c0_i32 = arith.constant 0 : i32
    %c0_i32_0 = arith.constant 0 : i32
    %c0_i32_1 = arith.constant 0 : i32
    return %c0_i32, %arg0, %c0_i32_0 : i32, i32, i32
  }
  func.func @transform_3(%arg0: i32) -> (i32, i32) {
    %c0_i32 = arith.constant 0 : i32
    %c0_i32_0 = arith.constant 0 : i32
    %c0_i32_1 = arith.constant 0 : i32
    return %c0_i32, %c0_i32_0 : i32, i32
  }
  func.func @transform_4(%arg0: i32) -> (i32, i32) {
    %c0_i32 = arith.constant 0 : i32
    %c0_i32_0 = arith.constant 0 : i32
    %c0_i32_1 = arith.constant 0 : i32
    return %c0_i32, %c0_i32_0 : i32, i32
  }
  func.func @transform_5(%arg0: i32) -> (i32, i32, i32) {
    %c0_i32 = arith.constant 0 : i32
    %c0_i32_0 = arith.constant 0 : i32
    %c0_i32_1 = arith.constant 0 : i32
    return %c0_i32, %arg0, %c0_i32_0 : i32, i32, i32
  }
}

</mosaic_0001>

<bundles_post_ra>
// kernel: tpu_custom_call.1
= control target key start
LH: loop header
LB: loop body
LE: loop exit
PB: predicated region body
PF: predicated region fallthrough
CT: control target
= control target key end

     0   :  { %s1049_s0 = inlined_call_operand.<no memory space> [shape: f32[1,1], index: 0, kind: input, shape index: {}]   ;;  %s1050_s1 = inlined_call_operand.<no memory space> [shape: f32[1,1], index: 1, kind: input, shape index: {}]   ;;  %s1051_s2 = inlined_call_operand.hbm [shape: f32[2,64,128], index: 2, kind: input, shape index: {}]   ;;  %s1052_s3 = inlined_call_operand.hbm [shape: bf16[128,128], index: 3, kind: input, shape index: {}]   ;;  %s1053_s4 = inlined_call_operand.vmem [shape: f32[1,128], index: 4, kind: input, shape index: {}]   ;;  %s1054_s5 = inlined_call_operand.hbm [shape: f32[2,64,128], index: 5, kind: output, shape index: {}]  }
   0x1   :  { %10 = sst [smem:[#allocation2]] %s1049_s0 }
   0x2   :  { %11 = sst [smem:[#allocation3]] %s1050_s1 }
   0x3   :  { %12 = vsyncpa [#allocation5], 0 }
   0x4   :  { %14 = vsyncpa [#allocation5 + $0x1], 0 }
   0x5   :  { %15 = vsyncpa [#allocation8], 0 }
   0x6   :  { %16 = vsyncpa [#allocation6], 0 }
   0x7   :  { %18 = vsyncpa [#allocation6 + $0x1], 0  ;;  %s857_s22 = smov 0   ;;  %s859_s23 = smov 0  }
   0x8   :  { %s861_s24 = smov 0   ;;  %s863_s25 = smov 0  }
   0x9 LB: > { %s878_s0 = sadd.s32 4294967295, %s803_s25   ;;  %s578_s1 = sadd.s32 4294967294, %s803_s25   ;;  %s803_s25 = sphi %s863_s25, %s1076_s25   ;;  %s799_s24 = sphi %s861_s24, %s1075_s24   ;;  %s795_s23 = sphi %s859_s23, %s1074_s23   ;;  %s791_s22 = sphi %s857_s22, %s1073_s22  }
   0xa   : > { %s882_s26 = sadd.s32 1, %s803_s25   ;;  %s73_s27 = sadd.s32 1, %s799_s24 }
   0xb   : > { %s70_s28 = ssub.s32 %s803_s25, %s882_s26  ;;  %p80_p0 = scmp.ne.s32.totalorder %s799_s24, %s795_s23 }
   0xc   : > { %p71_p1 = scmp.eq.s32.totalorder %s70_s28, 0  ;;  %p81_p2 = scmp.eq.s32.totalorder %s803_s25, 0 }
   0xd   : > { %p86_p3 = scmp.ne.s32.totalorder %s795_s23, %s791_s22  ;;  %p1055_p4 = scmp.eq.s32.totalorder %s878_s0, 0 }
   0xe   : > { %s894_s29 = scalar_select %p71_p1, %s799_s24, %s73_s27  }
   0xf   : > { %p896_p5 = por %p81_p2, %p80_p0  ;;  %p902_p6 = por %p1055_p4, %p86_p3 }
  0x10   : > { %p152_p7 = scmp.eq.s32.totalorder %s878_s0, 1  ;;  %p158_p8 = scmp.eq.s32.totalorder %s578_s1, 1 }
  0x11   : > { %s1060_s30 = scalar_select %p896_p5, 1, 0 }
  0x12   : > { %s1061_s6 = scalar_select %p902_p6, 1, 0 }
  0x13   : > { %p579_p9 = scmp.ge.s32.totalorder %s803_s25, 1  ;;  %p165_p10 = scmp.lt.s32.totalorder %s803_s25, 3 }
  0x14   : > { %p909_p11 = por %p152_p7, %p80_p0  ;;  %p913_p12 = por %p158_p8, %p86_p3 }
  0x15   : > { %p917_p13 = pnand %p579_p9, %p165_p10  ;;  %s805_s10 = smov [#allocation7]  }
  0x16   : > { %s1062_s7 = scalar_select %p909_p11, 1, 0 }
  0x17   : > { %s1063_s8 = scalar_select %p913_p12, 1, 0 }
  0x18   : > { %s1064_s9 = scalar_select %p917_p13, 1, 0 }
  0x19   : > { %p666_p1 = pneg %p917_p13  ;;  %s183_s11 = sshll.u32 %s805_s10, 4  ;;  %s184_s11 = int_to_ptr.vmem [resolvable:$true] %s183_s11 }
  0x1a   : > { %s733_s15 = scalar_lea.hbm %s1052_s3, 1024 }
  0x1b   : > { %p925_p2 = pnand %p666_p1, %p1055_p4  ;;  %p734_p0 = scmp.ne.s32.totalorder %s1052_s3, %s733_s15 }
  0x1c   : > { %p740_p9 = scmp.lt.u32.totalorder %s733_s15, %s1052_s3 }
  0x1d   : > { %p735_p3 = pneg %p925_p2 }
  0x1f   : > { %p736_p7 = pnand %p735_p3, %p734_p0 }
  0x21   : > { %p737_p8 = pneg %p736_p7 }
  0x23   : > { %p742_p10 = pnand %p740_p9, %p737_p8 }
  0x25   : > { %745 = shalt.err (!%p742_p10)
}
  0x26   : > { %s746_s20 = scalar_lea.vmem %s184_s11, 1024  ;;  %p754_p11 = scmp.lt.s32.totalorder %s184_s11, %s184_s11 }
  0x27   : > { %p747_p1 = scmp.ne.s32.totalorder %s184_s11, %s746_s20  ;;  %p755_p6 = scmp.lt.s32.totalorder %s746_s20, %s746_s20 }
  0x29   : > { %p749_p4 = pnand %p747_p1, %p735_p3  ;;  %p756_p13 = por %p755_p6, %p754_p11 }
  0x2b   : > { %p750_p12 = pneg %p749_p4 }
  0x2d   : > { %p757_p5 = pnand %p756_p13, %p750_p12 }
  0x2f   : > { %760 = shalt.err (!%p757_p5)
}
  0x30   : > { %s806_s21 = smov 64   ;;  %s807_s1 = smov 4  }
  0x31   : > { %669 = dma.hbm_to_vmem [thread:$0]  (!%p925_p2), %s1052_s3, 1024, %s184_s11, [#allocation8], %s806_s21, %s806_s21, %s807_s1  }
  0x32   : > { %p581_p0 = scmp.ge.s32.totalorder %s803_s25, 2 }
  0x34   : > { %196 = sbr.rel (%p581_p0) target bundleno = 74 (0x4a), region = 32 }
  0x3b   : > { %s200_s10 = sand.u32 1, %s799_s24   ;;  %s613_s13 = sshll.u32 %s803_s25, 9 }
  0x3c   : > { %s582_s12 = sshll.u32 %s200_s10, 6  ;;  %s210_s11 = scalar_lea.hbm %s1051_s2, %s613_s13 }
  0x3d   : > { %p1066_p4 = scmp.ne.s32.totalorder %s1060_s30, 0  ;;  %s204_s17 = scalar_lea.vmem [#allocation4], %s582_s12 }
  0x3e   : > { %s223_s18 = sshll.u32 %s204_s17, 4  ;;  %s808_s20 = smov 1024   ;;  %s224_s18 = int_to_ptr.vmem [resolvable:$true] %s223_s18 }
  0x3f   : > { %s647_s16 = scalar_select %p1066_p4, [#allocation0], [#allocation14] }
  0x40   : > { %648 = sst [smem:[#allocation11]] (%p1066_p4), %s808_s20  ;;  %s809_s21 = smov 512  }
  0x41   : > { %s215_s19 = sld [smem:[%s647_s16]]   ;;  %s810_s1 = smov 4  }
  0x42   : > { %649 = sst [smem:[#allocation11 + $0x1]] (%p1066_p4), %s809_s21  ;;  %s811_s27 = smov 128  }
  0x43   : > { %650 = sst [smem:[#allocation11 + $0x2]] (%p1066_p4), %s810_s1  ;;  %s812_s13 = smov 8  }
  0x44   : > { %651 = sst [smem:[#allocation11 + $0x3]] (%p1066_p4), %s811_s27  ;;  %s201_s14 = scalar_lea.sflag [#allocation5], %s200_s10 }
  0x45   : > { %652 = sst [smem:[#allocation11 + $0x4]] (%p1066_p4), %s811_s27  ;;  %s813_s15 = smov [#allocation10]  }
  0x46   : > { %653 = sst [smem:[#allocation11 + $0x5]] (%p1066_p4), %s812_s13 }
  0x47   : > { %s585_s28 = sshll.u32 %s215_s19, 26 }
  0x48   : > { %s586_s12 = sadd.s32 134217728, %s585_s28 }
  0x49   : > { %654 = dma.general (%p1066_p4), %s210_s11, 1024, %s224_s18, %s201_s14, %s813_s15, [#allocation11], %s586_s12, 0  }
  0x4a PF: > { %p1067_p5 = scmp.ne.s32.totalorder %s1064_s9, 0 }
  0x4b   : > { %s972_s16 = sand.u32 (!%p1067_p5), 1, %s795_s23   ;;  %p1068_p6 = scmp.ne.s32.totalorder (!%p1067_p5), %s1061_s6, 0 }
  0x4c   : > { %248 = sbr.rel (%p1067_p5) target bundleno = 353 (0x161), region = 40  ;;  %s588_s17 = sshll.u32 (!%p1067_p5), %s972_s16, 6 }
  0x4d   : > { %s251_s19 = scalar_lea.sflag (!%p1067_p5), [#allocation5], %s972_s16  ;;  %s978_s20 = scalar_lea.vmem (!%p1067_p5), [#allocation4], %s588_s17 }
  0x53   : > { %778 = dma.done.wait (%p1068_p6), %s251_s19, 1024  }
  0x54   : > { %780 = vsyncadd (%p1068_p6), %s251_s19, 4294966272  ;;  %p1069_p11 = scmp.eq.s32.totalorder %s878_s0, 0 }
  0x56   : > { %782 = dma.done.wait (%p1069_p11), [#allocation8], 1024   ;;  %p1070_p12 = pmov %p1069_p11 }
  0x57   : > { %v725_v0 = vld [vmem:[#allocation7] sm:$0xff]   ;;  %v726_v1 = vld [vmem:[#allocation7 + $0x8] sm:$0xff]   ;;  %v727_v2 = vld [vmem:[#allocation7 + $0x10] sm:$0xff]   ;;  %s995_s30 = scalar_lea.vmem [#allocation9], %s588_s17  ;;  %s288_s6 = sld [smem:[#allocation2]] }
  0x58   : > { %784 = vsyncadd (%p1070_p12), [#allocation8], 4294966272  ;;  %625 = vmatprep.subr.bf16.mxu0 %v725_v0  ;;  %v728_v3 = vld [vmem:[#allocation7 + $0x18] sm:$0xff]   ;;  %v290_v4 = vld [vmem:[%s978_s20] sm:$0xff]  ;;  %s289_s9 = sld [smem:[#allocation3]]  ;;  %s453_s18 = scalar_lea.sflag [#allocation6], %s972_s16 }
  0x59   : > { %626 = vmatpush3.bf16.msra.mxu0 %v725_v0  ;;  %v291_v5 = vld [vmem:[%s978_s20 + $0x8] sm:$0xff]  ;;  %v729_v7 = vld [vmem:[#allocation7 + $0x20] sm:$0xff]   ;;  %v731_v9 = vld [vmem:[#allocation7 + $0x30] sm:$0xff]  }
  0x5a   : > { %627 = vmatprep.subr.bf16.mxu0 %v726_v1  ;;  %v299_v6 = vpack.c.bf16 %v291_v5, %v290_v4  ;;  %v730_v8 = vld [vmem:[#allocation7 + $0x28] sm:$0xff]   ;;  %v732_v10 = vld [vmem:[#allocation7 + $0x38] sm:$0xff]   ;;  %v292_v11 = vld [vmem:[%s978_s20 + $0x10] sm:$0xff] }
  0x5b   : > { %v293_v12 = vld [vmem:[%s978_s20 + $0x18] sm:$0xff]  ;;  %v593_v14 = vld [vmem:[%s978_s20 + $0x30] sm:$0xff]  ;;  %v591_v16 = vld [vmem:[%s978_s20 + $0x20] sm:$0xff] }
  0x5c   : > { %641 = vmatprep.mubr.bf16.mxu0 %v299_v6  ;;  %v300_v13 = vpack.c.bf16 %v293_v12, %v292_v11  ;;  %v423_v15 = vsub.f32 0.0, %v593_v14  ;;  %v421_v17 = vsub.f32 0.0, %v591_v16  ;;  %v594_v18 = vld [vmem:[%s978_s20 + $0x38] sm:$0xff]  ;;  %v592_v19 = vld [vmem:[%s978_s20 + $0x28] sm:$0xff]  ;;  %v595_v24 = vld [vmem:[%s1053_s4] ss:$0 sm:$0xff] }
  0x5d   : > { %628 = vmatpush3.bf16.msra.mxu0 %v726_v1  ;;  %v424_v20 = vsub.f32 0.0, %v594_v18  ;;  %v422_v21 = vsub.f32 0.0, %v592_v19  ;;  %v425_v22 = vstv %s288_s6 }
  0x5e   : > { %629 = vmatprep.subr.bf16.mxu0 %v727_v2  ;;  %445 = vst [vmem:[%s995_s30 + $0x10] sm:$0xff] %v423_v15  ;;  %443 = vst [vmem:[%s995_s30] sm:$0xff] %v421_v17  ;;  %v434_v23 = vstv %s289_s9  ;;  %v428_v25 = vmul.f32 %v593_v14, %v425_v22  ;;  %v426_v27 = vmul.f32 %v591_v16, %v425_v22 }
  0x5f   : > { %446 = vst [vmem:[%s995_s30 + $0x18] sm:$0xff] %v424_v20  ;;  %444 = vst [vmem:[%s995_s30 + $0x8] sm:$0xff] %v422_v21  ;;  %v437_v28 = vmul.f32 %v434_v23, %v292_v11  ;;  %v429_v31 = vmul.f32 %v594_v18, %v425_v22  ;;  %v435_v32 = vmul.f32 %v434_v23, %v290_v4 }
  0x60   : > { %v427_v35 = vmul.f32 %v592_v19, %v425_v22  ;;  %v438_v36 = vmul.f32 %v434_v23, %v293_v12  ;;  %v436_v40 = vmul.f32 %v434_v23, %v291_v5 }
  0x61   : > { %630 = vmatpush3.bf16.msra.mxu0 %v727_v2 }
  0x62   : > { %631 = vmatprep.subr.bf16.mxu0 %v728_v3 }
  0x65   : > { %632 = vmatpush3.bf16.msra.mxu0 %v728_v3 }
  0x66   : > { %633 = vmatprep.subr.bf16.mxu0 %v729_v7 }
  0x69   : > { %634 = vmatpush3.bf16.msra.mxu0 %v729_v7 }
  0x6a   : > { %635 = vmatprep.subr.bf16.mxu0 %v730_v8 }
  0x6d   : > { %636 = vmatpush3.bf16.msra.mxu0 %v730_v8 }
  0x6e   : > { %637 = vmatprep.subr.bf16.mxu0 %v731_v9 }
  0x71   : > { %638 = vmatpush3.bf16.msra.mxu0 %v731_v9 }
  0x72   : > { %639 = vmatprep.subr.bf16.mxu0 %v732_v10 }
  0x75   : > { %640 = vmatpush3.bf16.msra.mxu0 %v732_v10 }
  0x78   : > { %642 = vmatmul.mubr.bf16.vlgmr.msra.gmra.mrb[0].mxu0 %v300_v13 }
 0x14b   : > { %v643_v26 = vpop.f32.mrb[0].mxu0 }
 0x14c   : > { %v415_v29 = vadd.f32 %v643_v26, %v595_v24  ;;  %v406_v30 = vpop.f32.mrb[1].mxu0 }
 0x14d   : > { %v407_v33 = vadd.f32 %v595_v24, %v406_v30  ;;  %v644_v34 = vpop.f32.mrb[2].mxu0 }
 0x14e   : > { %v432_v37 = vsub.f32 %v415_v29, %v428_v25  ;;  %v418_v38 = vadd.f32 %v644_v34, %v595_v24  ;;  %v409_v39 = vpop.f32.mrb[3].mxu0 }
 0x14f   : > { %v430_v41 = vsub.f32 %v407_v33, %v426_v27  ;;  %v410_v42 = vadd.f32 %v595_v24, %v409_v39 }
 0x150   : > { %v441_v43 = vadd.f32 %v437_v28, %v432_v37  ;;  %v433_v44 = vsub.f32 %v418_v38, %v429_v31 }
 0x151   : > { %v439_v45 = vadd.f32 %v435_v32, %v430_v41  ;;  %v431_v46 = vsub.f32 %v410_v42, %v427_v35 }
 0x152   : > { %606 = vst [vmem:[%s995_s30 + $0x30] sm:$0xff] %v441_v43  ;;  %v442_v47 = vadd.f32 %v438_v36, %v433_v44 }
 0x153   : > { %604 = vst [vmem:[%s995_s30 + $0x20] sm:$0xff] %v439_v45  ;;  %v440_v48 = vadd.f32 %v436_v40, %v431_v46 }
 0x154   : > { %607 = vst [vmem:[%s995_s30 + $0x38] sm:$0xff] %v442_v47 }
 0x155   : > { %605 = vst [vmem:[%s995_s30 + $0x28] sm:$0xff] %v440_v48 }
 0x156   : > { %s614_s21 = sshll.u32 %s878_s0, 9  ;;  %s482_s1 = sshll.u32 %s995_s30, 4  ;;  %s483_s1 = int_to_ptr.vmem [resolvable:$true] %s482_s1 }
 0x157   : > { %s465_s13 = scalar_lea.hbm %s1054_s5, %s614_s21  ;;  %s814_s12 = smov 512  }
 0x158   : > { %p1071_p13 = scmp.ne.s32.totalorder %s1062_s7, 0  ;;  %s815_s14 = smov 1024  }
 0x159   : > { %s816_s15 = smov 4   ;;  %s817_s16 = smov 128  }
 0x15a   : > { %658 = sst [smem:[#allocation13]] (%p1071_p13), %s814_s12  ;;  %s818_s0 = smov 8  }
 0x15b   : > { %659 = sst [smem:[#allocation13 + $0x1]] (%p1071_p13), %s815_s14  ;;  %s819_s17 = smov [#allocation12]  }
 0x15c   : > { %660 = sst [smem:[#allocation13 + $0x2]] (%p1071_p13), %s816_s15  ;;  %s820_s19 = smov 0  }
 0x15d   : > { %661 = sst [smem:[#allocation13 + $0x3]] (%p1071_p13), %s817_s16 }
 0x15e   : > { %662 = sst [smem:[#allocation13 + $0x4]] (%p1071_p13), %s817_s16 }
 0x15f   : > { %663 = sst [smem:[#allocation13 + $0x5]] (%p1071_p13), %s818_s0 }
 0x160   : > { %664 = dma.general (%p1071_p13), %s483_s1, 1024, %s465_s13, %s453_s18, %s819_s17, [#allocation13], %s820_s19, 0  }
 0x161 PF: > { %s510_s20 = sand.u32 1, %s791_s22   ;;  %p1072_p2 = scmp.ne.s32.totalorder %s1063_s8, 0 }
 0x162   : > { %s511_s30 = scalar_lea.sflag [#allocation6], %s510_s20 }
 0x163   : > { %p671_p3 = pnand %p581_p0, %p1072_p2 }
 0x165   : > { %786 = dma.done.wait (!%p671_p3), %s511_s30, 1024  }
 0x166   : > { %788 = vsyncadd (!%p671_p3), %s511_s30, 4294966272  ;;  %p21_p7 = scmp.ge.s32.totalorder %s882_s26, 4   ;;  %s1073_s22 = smov %s795_s23 }
 0x167   : > { %s1074_s23 = smov %s799_s24  ;;  %s1075_s24 = smov %s894_s29 }
 0x168   : > { %s1076_s25 = smov %s882_s26  ;;  %23 = sbr.rel (!%p21_p7) target bundleno = 9 (0x9), region = 101 }
 0x16f   :  { %516 = vsyncpa [#allocation5], 1 }
 0x170   :  { %518 = vsyncpa [#allocation5 + $0x1], 1 }
 0x171   :  { %519 = vsyncpa [#allocation8], 1 }
 0x172   :  { %520 = vsyncpa [#allocation6], 1 }
 0x173   :  { %522 = vsyncpa [#allocation6 + $0x1], 1 }

// kernel: tpu_custom_call.1
= control target key start
LH: loop header
LB: loop body
LE: loop exit
PB: predicated region body
PF: predicated region fallthrough
CT: control target
= control target key end

     0   :  { %s1049_s0 = inlined_call_operand.<no memory space> [shape: f32[1,1], index: 0, kind: input, shape index: {}]   ;;  %s1050_s1 = inlined_call_operand.<no memory space> [shape: f32[1,1], index: 1, kind: input, shape index: {}]   ;;  %s1051_s2 = inlined_call_operand.hbm [shape: f32[2,64,128], index: 2, kind: input, shape index: {}]   ;;  %s1052_s3 = inlined_call_operand.hbm [shape: bf16[128,128], index: 3, kind: input, shape index: {}]   ;;  %s1053_s4 = inlined_call_operand.vmem [shape: f32[1,128], index: 4, kind: input, shape index: {}]   ;;  %s1054_s5 = inlined_call_operand.hbm [shape: f32[2,64,128], index: 5, kind: output, shape index: {}]  }
   0x1   :  { %10 = sst [smem:[#allocation2]] %s1049_s0 }
   0x2   :  { %11 = sst [smem:[#allocation3]] %s1050_s1 }
   0x3   :  { %12 = vsyncpa [#allocation5], 0 }
   0x4   :  { %14 = vsyncpa [#allocation5 + $0x1], 0 }
   0x5   :  { %15 = vsyncpa [#allocation8], 0 }
   0x6   :  { %16 = vsyncpa [#allocation6], 0 }
   0x7   :  { %18 = vsyncpa [#allocation6 + $0x1], 0  ;;  %s857_s22 = smov 0   ;;  %s859_s23 = smov 0  }
   0x8   :  { %s861_s24 = smov 0   ;;  %s863_s25 = smov 0  }
   0x9 LB: > { %s878_s0 = sadd.s32 4294967295, %s803_s25   ;;  %s578_s1 = sadd.s32 4294967294, %s803_s25   ;;  %s803_s25 = sphi %s863_s25, %s1076_s25   ;;  %s799_s24 = sphi %s861_s24, %s1075_s24   ;;  %s795_s23 = sphi %s859_s23, %s1074_s23   ;;  %s791_s22 = sphi %s857_s22, %s1073_s22  }
   0xa   : > { %s882_s26 = sadd.s32 1, %s803_s25   ;;  %s73_s27 = sadd.s32 1, %s799_s24 }
   0xb   : > { %s70_s28 = ssub.s32 %s803_s25, %s882_s26  ;;  %p80_p0 = scmp.ne.s32.totalorder %s799_s24, %s795_s23 }
   0xc   : > { %p71_p1 = scmp.eq.s32.totalorder %s70_s28, 0  ;;  %p81_p2 = scmp.eq.s32.totalorder %s803_s25, 0 }
   0xd   : > { %p86_p3 = scmp.ne.s32.totalorder %s795_s23, %s791_s22  ;;  %p1055_p4 = scmp.eq.s32.totalorder %s878_s0, 0 }
   0xe   : > { %s894_s29 = scalar_select %p71_p1, %s799_s24, %s73_s27  }
   0xf   : > { %p896_p5 = por %p81_p2, %p80_p0  ;;  %p902_p6 = por %p1055_p4, %p86_p3 }
  0x10   : > { %p152_p7 = scmp.eq.s32.totalorder %s878_s0, 1  ;;  %p158_p8 = scmp.eq.s32.totalorder %s578_s1, 1 }
  0x11   : > { %s1060_s30 = scalar_select %p896_p5, 1, 0 }
  0x12   : > { %s1061_s6 = scalar_select %p902_p6, 1, 0 }
  0x13   : > { %p579_p9 = scmp.ge.s32.totalorder %s803_s25, 1  ;;  %p165_p10 = scmp.lt.s32.totalorder %s803_s25, 3 }
  0x14   : > { %p909_p11 = por %p152_p7, %p80_p0  ;;  %p913_p12 = por %p158_p8, %p86_p3 }
  0x15   : > { %p917_p13 = pnand %p579_p9, %p165_p10  ;;  %s805_s10 = smov [#allocation7]  }
  0x16   : > { %s1062_s7 = scalar_select %p909_p11, 1, 0 }
  0x17   : > { %s1063_s8 = scalar_select %p913_p12, 1, 0 }
  0x18   : > { %s1064_s9 = scalar_select %p917_p13, 1, 0 }
  0x19   : > { %p666_p1 = pneg %p917_p13  ;;  %s183_s11 = sshll.u32 %s805_s10, 4  ;;  %s184_s11 = int_to_ptr.vmem [resolvable:$true] %s183_s11 }
  0x1a   : > { %s733_s15 = scalar_lea.hbm %s1052_s3, 1024 }
  0x1b   : > { %p925_p2 = pnand %p666_p1, %p1055_p4  ;;  %p734_p0 = scmp.ne.s32.totalorder %s1052_s3, %s733_s15 }
  0x1c   : > { %p740_p9 = scmp.lt.u32.totalorder %s733_s15, %s1052_s3 }
  0x1d   : > { %p735_p3 = pneg %p925_p2 }
  0x1f   : > { %p736_p7 = pnand %p735_p3, %p734_p0 }
  0x21   : > { %p737_p8 = pneg %p736_p7 }
  0x23   : > { %p742_p10 = pnand %p740_p9, %p737_p8 }
  0x25   : > { %745 = shalt.err (!%p742_p10)
}
  0x26   : > { %s746_s20 = scalar_lea.vmem %s184_s11, 1024  ;;  %p754_p11 = scmp.lt.s32.totalorder %s184_s11, %s184_s11 }
  0x27   : > { %p747_p1 = scmp.ne.s32.totalorder %s184_s11, %s746_s20  ;;  %p755_p6 = scmp.lt.s32.totalorder %s746_s20, %s746_s20 }
  0x29   : > { %p749_p4 = pnand %p747_p1, %p735_p3  ;;  %p756_p13 = por %p755_p6, %p754_p11 }
  0x2b   : > { %p750_p12 = pneg %p749_p4 }
  0x2d   : > { %p757_p5 = pnand %p756_p13, %p750_p12 }
  0x2f   : > { %760 = shalt.err (!%p757_p5)
}
  0x30   : > { %s806_s21 = smov 64   ;;  %s807_s1 = smov 4  }
  0x31   : > { %669 = dma.hbm_to_vmem [thread:$0]  (!%p925_p2), %s1052_s3, 1024, %s184_s11, [#allocation8], %s806_s21, %s806_s21, %s807_s1  }
  0x32   : > { %p581_p0 = scmp.ge.s32.totalorder %s803_s25, 2 }
  0x34   : > { %196 = sbr.rel (%p581_p0) target bundleno = 74 (0x4a), region = 32 }
  0x3b   : > { %s200_s10 = sand.u32 1, %s799_s24   ;;  %s613_s13 = sshll.u32 %s803_s25, 9 }
  0x3c   : > { %s582_s12 = sshll.u32 %s200_s10, 6  ;;  %s210_s11 = scalar_lea.hbm %s1051_s2, %s613_s13 }
  0x3d   : > { %p1066_p4 = scmp.ne.s32.totalorder %s1060_s30, 0  ;;  %s204_s17 = scalar_lea.vmem [#allocation4], %s582_s12 }
  0x3e   : > { %s223_s18 = sshll.u32 %s204_s17, 4  ;;  %s808_s20 = smov 1024   ;;  %s224_s18 = int_to_ptr.vmem [resolvable:$true] %s223_s18 }
  0x3f   : > { %s647_s16 = scalar_select %p1066_p4, [#allocation0], [#allocation14] }
  0x40   : > { %648 = sst [smem:[#allocation11]] (%p1066_p4), %s808_s20  ;;  %s809_s21 = smov 512  }
  0x41   : > { %s215_s19 = sld [smem:[%s647_s16]]   ;;  %s810_s1 = smov 4  }
  0x42   : > { %649 = sst [smem:[#allocation11 + $0x1]] (%p1066_p4), %s809_s21  ;;  %s811_s27 = smov 128  }
  0x43   : > { %650 = sst [smem:[#allocation11 + $0x2]] (%p1066_p4), %s810_s1  ;;  %s812_s13 = smov 8  }
  0x44   : > { %651 = sst [smem:[#allocation11 + $0x3]] (%p1066_p4), %s811_s27  ;;  %s201_s14 = scalar_lea.sflag [#allocation5], %s200_s10 }
  0x45   : > { %652 = sst [smem:[#allocation11 + $0x4]] (%p1066_p4), %s811_s27  ;;  %s813_s15 = smov [#allocation10]  }
  0x46   : > { %653 = sst [smem:[#allocation11 + $0x5]] (%p1066_p4), %s812_s13 }
  0x47   : > { %s585_s28 = sshll.u32 %s215_s19, 26 }
  0x48   : > { %s586_s12 = sadd.s32 134217728, %s585_s28 }
  0x49   : > { %654 = dma.general (%p1066_p4), %s210_s11, 1024, %s224_s18, %s201_s14, %s813_s15, [#allocation11], %s586_s12, 0  }
  0x4a PF: > { %p1067_p5 = scmp.ne.s32.totalorder %s1064_s9, 0 }
  0x4b   : > { %s972_s16 = sand.u32 (!%p1067_p5), 1, %s795_s23   ;;  %p1068_p6 = scmp.ne.s32.totalorder (!%p1067_p5), %s1061_s6, 0 }
  0x4c   : > { %248 = sbr.rel (%p1067_p5) target bundleno = 353 (0x161), region = 40  ;;  %s588_s17 = sshll.u32 (!%p1067_p5), %s972_s16, 6 }
  0x4d   : > { %s251_s19 = scalar_lea.sflag (!%p1067_p5), [#allocation5], %s972_s16  ;;  %s978_s20 = scalar_lea.vmem (!%p1067_p5), [#allocation4], %s588_s17 }
  0x53   : > { %778 = dma.done.wait (%p1068_p6), %s251_s19, 1024  }
  0x54   : > { %780 = vsyncadd (%p1068_p6), %s251_s19, 4294966272  ;;  %p1069_p11 = scmp.eq.s32.totalorder %s878_s0, 0 }
  0x56   : > { %782 = dma.done.wait (%p1069_p11), [#allocation8], 1024   ;;  %p1070_p12 = pmov %p1069_p11 }
  0x57   : > { %v725_v0 = vld [vmem:[#allocation7] sm:$0xff]   ;;  %v726_v1 = vld [vmem:[#allocation7 + $0x8] sm:$0xff]   ;;  %v727_v2 = vld [vmem:[#allocation7 + $0x10] sm:$0xff]   ;;  %s995_s30 = scalar_lea.vmem [#allocation9], %s588_s17  ;;  %s288_s6 = sld [smem:[#allocation2]] }
  0x58   : > { %784 = vsyncadd (%p1070_p12), [#allocation8], 4294966272  ;;  %625 = vmatprep.subr.bf16.mxu0 %v725_v0  ;;  %v728_v3 = vld [vmem:[#allocation7 + $0x18] sm:$0xff]   ;;  %v290_v4 = vld [vmem:[%s978_s20] sm:$0xff]  ;;  %s289_s9 = sld [smem:[#allocation3]]  ;;  %s453_s18 = scalar_lea.sflag [#allocation6], %s972_s16 }
  0x59   : > { %626 = vmatpush3.bf16.msra.mxu0 %v725_v0  ;;  %v291_v5 = vld [vmem:[%s978_s20 + $0x8] sm:$0xff]  ;;  %v729_v7 = vld [vmem:[#allocation7 + $0x20] sm:$0xff]   ;;  %v731_v9 = vld [vmem:[#allocation7 + $0x30] sm:$0xff]  }
  0x5a   : > { %627 = vmatprep.subr.bf16.mxu0 %v726_v1  ;;  %v299_v6 = vpack.c.bf16 %v291_v5, %v290_v4  ;;  %v730_v8 = vld [vmem:[#allocation7 + $0x28] sm:$0xff]   ;;  %v732_v10 = vld [vmem:[#allocation7 + $0x38] sm:$0xff]   ;;  %v292_v11 = vld [vmem:[%s978_s20 + $0x10] sm:$0xff] }
  0x5b   : > { %v293_v12 = vld [vmem:[%s978_s20 + $0x18] sm:$0xff]  ;;  %v593_v14 = vld [vmem:[%s978_s20 + $0x30] sm:$0xff]  ;;  %v591_v16 = vld [vmem:[%s978_s20 + $0x20] sm:$0xff] }
  0x5c   : > { %641 = vmatprep.mubr.bf16.mxu0 %v299_v6  ;;  %v300_v13 = vpack.c.bf16 %v293_v12, %v292_v11  ;;  %v423_v15 = vsub.f32 0.0, %v593_v14  ;;  %v421_v17 = vsub.f32 0.0, %v591_v16  ;;  %v594_v18 = vld [vmem:[%s978_s20 + $0x38] sm:$0xff]  ;;  %v592_v19 = vld [vmem:[%s978_s20 + $0x28] sm:$0xff]  ;;  %v595_v24 = vld [vmem:[%s1053_s4] ss:$0 sm:$0xff] }
  0x5d   : > { %628 = vmatpush3.bf16.msra.mxu0 %v726_v1  ;;  %v424_v20 = vsub.f32 0.0, %v594_v18  ;;  %v422_v21 = vsub.f32 0.0, %v592_v19  ;;  %v425_v22 = vstv %s288_s6 }
  0x5e   : > { %629 = vmatprep.subr.bf16.mxu0 %v727_v2  ;;  %445 = vst [vmem:[%s995_s30 + $0x10] sm:$0xff] %v423_v15  ;;  %443 = vst [vmem:[%s995_s30] sm:$0xff] %v421_v17  ;;  %v434_v23 = vstv %s289_s9  ;;  %v428_v25 = vmul.f32 %v593_v14, %v425_v22  ;;  %v426_v27 = vmul.f32 %v591_v16, %v425_v22 }
  0x5f   : > { %446 = vst [vmem:[%s995_s30 + $0x18] sm:$0xff] %v424_v20  ;;  %444 = vst [vmem:[%s995_s30 + $0x8] sm:$0xff] %v422_v21  ;;  %v437_v28 = vmul.f32 %v434_v23, %v292_v11  ;;  %v429_v31 = vmul.f32 %v594_v18, %v425_v22  ;;  %v435_v32 = vmul.f32 %v434_v23, %v290_v4 }
  0x60   : > { %v427_v35 = vmul.f32 %v592_v19, %v425_v22  ;;  %v438_v36 = vmul.f32 %v434_v23, %v293_v12  ;;  %v436_v40 = vmul.f32 %v434_v23, %v291_v5 }
  0x61   : > { %630 = vmatpush3.bf16.msra.mxu0 %v727_v2 }
  0x62   : > { %631 = vmatprep.subr.bf16.mxu0 %v728_v3 }
  0x65   : > { %632 = vmatpush3.bf16.msra.mxu0 %v728_v3 }
  0x66   : > { %633 = vmatprep.subr.bf16.mxu0 %v729_v7 }
  0x69   : > { %634 = vmatpush3.bf16.msra.mxu0 %v729_v7 }
  0x6a   : > { %635 = vmatprep.subr.bf16.mxu0 %v730_v8 }
  0x6d   : > { %636 = vmatpush3.bf16.msra.mxu0 %v730_v8 }
  0x6e   : > { %637 = vmatprep.subr.bf16.mxu0 %v731_v9 }
  0x71   : > { %638 = vmatpush3.bf16.msra.mxu0 %v731_v9 }
  0x72   : > { %639 = vmatprep.subr.bf16.mxu0 %v732_v10 }
  0x75   : > { %640 = vmatpush3.bf16.msra.mxu0 %v732_v10 }
  0x78   : > { %642 = vmatmul.mubr.bf16.vlgmr.msra.gmra.mrb[0].mxu0 %v300_v13 }
 0x14b   : > { %v643_v26 = vpop.f32.mrb[0].mxu0 }
 0x14c   : > { %v415_v29 = vadd.f32 %v643_v26, %v595_v24  ;;  %v406_v30 = vpop.f32.mrb[1].mxu0 }
 0x14d   : > { %v407_v33 = vadd.f32 %v595_v24, %v406_v30  ;;  %v644_v34 = vpop.f32.mrb[2].mxu0 }
 0x14e   : > { %v432_v37 = vsub.f32 %v415_v29, %v428_v25  ;;  %v418_v38 = vadd.f32 %v644_v34, %v595_v24  ;;  %v409_v39 = vpop.f32.mrb[3].mxu0 }
 0x14f   : > { %v430_v41 = vsub.f32 %v407_v33, %v426_v27  ;;  %v410_v42 = vadd.f32 %v595_v24, %v409_v39 }
 0x150   : > { %v441_v43 = vadd.f32 %v437_v28, %v432_v37  ;;  %v433_v44 = vsub.f32 %v418_v38, %v429_v31 }
 0x151   : > { %v439_v45 = vadd.f32 %v435_v32, %v430_v41  ;;  %v431_v46 = vsub.f32 %v410_v42, %v427_v35 }
 0x152   : > { %606 = vst [vmem:[%s995_s30 + $0x30] sm:$0xff] %v441_v43  ;;  %v442_v47 = vadd.f32 %v438_v36, %v433_v44 }
 0x153   : > { %604 = vst [vmem:[%s995_s30 + $0x20] sm:$0xff] %v439_v45  ;;  %v440_v48 = vadd.f32 %v436_v40, %v431_v46 }
 0x154   : > { %607 = vst [vmem:[%s995_s30 + $0x38] sm:$0xff] %v442_v47 }
 0x155   : > { %605 = vst [vmem:[%s995_s30 + $0x28] sm:$0xff] %v440_v48 }
 0x156   : > { %s614_s21 = sshll.u32 %s878_s0, 9  ;;  %s482_s1 = sshll.u32 %s995_s30, 4  ;;  %s483_s1 = int_to_ptr.vmem [resolvable:$true] %s482_s1 }
 0x157   : > { %s465_s13 = scalar_lea.hbm %s1054_s5, %s614_s21  ;;  %s814_s12 = smov 512  }
 0x158   : > { %p1071_p13 = scmp.ne.s32.totalorder %s1062_s7, 0  ;;  %s815_s14 = smov 1024  }
 0x159   : > { %s816_s15 = smov 4   ;;  %s817_s16 = smov 128  }
 0x15a   : > { %658 = sst [smem:[#allocation13]] (%p1071_p13), %s814_s12  ;;  %s818_s0 = smov 8  }
 0x15b   : > { %659 = sst [smem:[#allocation13 + $0x1]] (%p1071_p13), %s815_s14  ;;  %s819_s17 = smov [#allocation12]  }
 0x15c   : > { %660 = sst [smem:[#allocation13 + $0x2]] (%p1071_p13), %s816_s15  ;;  %s820_s19 = smov 0  }
 0x15d   : > { %661 = sst [smem:[#allocation13 + $0x3]] (%p1071_p13), %s817_s16 }
 0x15e   : > { %662 = sst [smem:[#allocation13 + $0x4]] (%p1071_p13), %s817_s16 }
 0x15f   : > { %663 = sst [smem:[#allocation13 + $0x5]] (%p1071_p13), %s818_s0 }
 0x160   : > { %664 = dma.general (%p1071_p13), %s483_s1, 1024, %s465_s13, %s453_s18, %s819_s17, [#allocation13], %s820_s19, 0  }
 0x161 PF: > { %s510_s20 = sand.u32 1, %s791_s22   ;;  %p1072_p2 = scmp.ne.s32.totalorder %s1063_s8, 0 }
 0x162   : > { %s511_s30 = scalar_lea.sflag [#allocation6], %s510_s20 }
 0x163   : > { %p671_p3 = pnand %p581_p0, %p1072_p2 }
 0x165   : > { %786 = dma.done.wait (!%p671_p3), %s511_s30, 1024  }
 0x166   : > { %788 = vsyncadd (!%p671_p3), %s511_s30, 4294966272  ;;  %p21_p7 = scmp.ge.s32.totalorder %s882_s26, 4   ;;  %s1073_s22 = smov %s795_s23 }
 0x167   : > { %s1074_s23 = smov %s799_s24  ;;  %s1075_s24 = smov %s894_s29 }
 0x168   : > { %s1076_s25 = smov %s882_s26  ;;  %23 = sbr.rel (!%p21_p7) target bundleno = 9 (0x9), region = 101 }
 0x16f   :  { %516 = vsyncpa [#allocation5], 1 }
 0x170   :  { %518 = vsyncpa [#allocation5 + $0x1], 1 }
 0x171   :  { %519 = vsyncpa [#allocation8], 1 }
 0x172   :  { %520 = vsyncpa [#allocation6], 1 }
 0x173   :  { %522 = vsyncpa [#allocation6 + $0x1], 1 }

</bundles_post_ra>
